<compile_context>
chip_gen: v5e
topology: v5e:2x2
jax: 0.10.0
libtpu: 0.0.40
codegen_flags: <defaults>
</compile_context>

<pallas_src>
import jax
import jax.numpy as jnp
from jax.experimental import pallas as pl
from jax.experimental.pallas import tpu as pltpu

_LAYER_DIMS = [(4, 16), (16, 64), (64, 128), (128, 64), (64, 16)]


def _mlp_kernel(x_ref,
                w1, b1, w2, b2, w3, b3, w4, b4, w5, b5, w6, b6,
                o_ref):
    """One (features, tb) batch tile of the 6-layer MLP, feature-major."""
    compute_dtype = w2.dtype   # MXU operand dtype for layers 2..6 (bf16 or f32)
    ew_dtype = b1.dtype        # bias-add / ReLU dtype (bf16 on v6e/v7x, f32 on v5e)

    # Hoist bias loads once (JAX does not CSE broadcast_in_dim).
    b1v, b2v, b3v = b1[...], b2[...], b3[...]
    b4v, b5v, b6v = b4[...], b5[...], b6[...]

    # Layer 1 in f32: w1 is only 16x4, so this is a near-empty MXU pass and the
    # f32 input tile needs no cast.
    h = jnp.dot(w1[...], x_ref[...], preferred_element_type=jnp.float32)
    h = jnp.maximum(h.astype(ew_dtype) + b1v, 0).astype(compute_dtype)

    def layer(h, w_ref, bv):
        # (out_f, in_f) @ (in_f, tb) -> (out_f, tb); f32 MXU accumulation, then
        # bias-add + ReLU in ew_dtype (packed bf16 on v6e/v7x, f32 on v5e).
        y = jnp.dot(w_ref[...], h, preferred_element_type=jnp.float32)
        return jnp.maximum(y.astype(ew_dtype) + bv, 0).astype(compute_dtype)

    h = layer(h, w2, b2v)
    h = layer(h, w3, b3v)
    h = layer(h, w4, b4v)
    h = layer(h, w5, b5v)

    # Final projection, no activation; f32 bias add. The (out_dim, tb) store is
    # lane-dense (batch on the lane axis) -> no single-lane masked vst.
    y = jnp.dot(w6[...], h, preferred_element_type=jnp.float32)
    o_ref[...] = (y + b6v).astype(o_ref.dtype)


def _elementwise_bf16_default():
    """Packed-bf16 VALU is native on v6e/v7x; on v5e (and older) bf16
    elementwise math is emulated, so keep bias-add/ReLU in f32 there."""
    try:
        kind = jax.devices()[0].device_kind.lower()
    except Exception:
        return False
    return not any(t in kind for t in ("v2", "v3", "v4", "v5 lite", "v5e", "v5litepod"))


def _pick_batch_tile(B, block_b):
    """Batch tile: multiple of 128 lanes, capped at block_b, and (for v7x's two
    TensorCores, which shard the 'parallel' batch axis) >=2 tiles when B allows."""
    tb = max(128, min(block_b, pl.cdiv(B, 128) * 128))
    tb -= tb % 128
    if B > 128 and pl.cdiv(B, tb) < 2:
        tb = min(tb, max(128, pl.cdiv(pl.cdiv(B, 2), 128) * 128))
    return tb


def over_proj_net_l(x, params, *, block_b=4096, use_bf16=True,
                    elementwise_bf16=None):
    """OverProjNetL forward. x: (B, 4) f32; params: list of (w (out,in), b (out,1))."""
    B, in_dim = x.shape
    out_dim = params[-1][0].shape[0]

    compute_dtype = jnp.bfloat16 if use_bf16 else jnp.float32
    if elementwise_bf16 is None:
        elementwise_bf16 = _elementwise_bf16_default()
    ew_dtype = compute_dtype if (use_bf16 and elementwise_bf16) else jnp.float32

    tb = _pick_batch_tile(B, block_b)
    num_tiles = pl.cdiv(B, tb)

    # Feature-major input: single fused XLA transpose pass, no pad, no cast
    # (layer 1 runs in f32). The ragged last tile is edge-masked by Pallas.
    x_t = x.astype(jnp.float32).T                              # (in_dim, B)

    flat_params = []
    for li, (w, b) in enumerate(params):
        w_dt = jnp.float32 if li == 0 else compute_dtype        # layer-1 matmul in f32
        b_dt = jnp.float32 if li == len(params) - 1 else ew_dtype
        flat_params.append(w.astype(w_dt))
        flat_params.append(b.astype(b_dt))

    def const_spec(p):
        return pl.BlockSpec(p.shape, lambda i: (0, 0))

    flops = 2 * B * sum(i * o for (i, o) in _LAYER_DIMS + [(16, out_dim)])
    bytes_accessed = (x_t.size * x_t.dtype.itemsize
                      + B * out_dim * 4
                      + sum(int(p.size) * p.dtype.itemsize for p in flat_params))

    out_t = pl.pallas_call(
        _mlp_kernel,
        out_shape=jax.ShapeDtypeStruct((out_dim, B), jnp.float32),
        grid=(num_tiles,),
        in_specs=[pl.BlockSpec((in_dim, tb), lambda i: (0, i))]
                 + [const_spec(p) for p in flat_params],
        out_specs=pl.BlockSpec((out_dim, tb), lambda i: (0, i)),
        compiler_params=pltpu.CompilerParams(
            dimension_semantics=("parallel",),
            vmem_limit_bytes=32 * 1024 * 1024),
        cost_estimate=pl.CostEstimate(
            flops=flops, transcendentals=0, bytes_accessed=bytes_accessed),
    )(x_t, *flat_params)

    # NOTE: garbage lanes in the ragged last input block are safe only because
    # every op is per-batch-column (no cross-batch reduction); the masked
    # output store discards them.
    return out_t.T                                             # (B, out_dim)


def make_params(key, projection_axis="x"):
    """Deterministic init mimicking nn.Linear's default U(-1/sqrt(fan_in)).
    Weights stored PyTorch-style as (out, in); biases as (out, 1)."""
    dims = [4, 16, 64, 128, 64, 16]
    out_final = 2 if projection_axis == "both" else 1
    layer_dims = list(zip(dims, dims[1:])) + [(16, out_final)]

    params = []
    for (fan_in, fan_out) in layer_dims:
        key, kw, kb = jax.random.split(key, 3)
        bound = float(fan_in) ** -0.5
        w = jax.random.uniform(kw, (fan_out, fan_in), jnp.float32, -bound, bound)
        b = jax.random.uniform(kb, (fan_out, 1), jnp.float32, -bound, bound)
        params.append((w, b))
    return params


def reference_forward(x, params):
    """Pure-JAX reference matching torch semantics: y = x @ W.T + b."""
    h = x
    for i, (w, b) in enumerate(params):
        h = h @ w.T + b.T
        if i < len(params) - 1:
            h = jnp.maximum(h, 0.0)
    return h


if __name__ == "__main__":
    key = jax.random.PRNGKey(0)
    k_x1, k_x2, k_p = jax.random.split(key, 3)

    params = make_params(k_p, projection_axis="x")

    # Small-batch smoke test (single tile), f32 path faithful to torch numerics.
    x_small = jax.random.normal(k_x1, (8, 4), jnp.float32)
    ref_small = reference_forward(x_small, params)
    out_small = jax.block_until_ready(over_proj_net_l(x_small, params, use_bf16=False))
    assert out_small.shape == (8, 1), out_small.shape
    assert jnp.allclose(out_small, ref_small, atol=1e-4, rtol=1e-4)

    # Multi-tile + ragged-last-block path: B=300 -> two 256-wide tiles, second
    # one partial (exercises Pallas edge masking and the >=2-tile v7x logic).
    x_big = jax.random.normal(k_x2, (300, 4), jnp.float32)
    ref_big = reference_forward(x_big, params)

    out_f32 = jax.block_until_ready(over_proj_net_l(x_big, params, use_bf16=False))
    assert out_f32.shape == (300, 1), out_f32.shape
    assert jnp.allclose(out_f32, ref_big, atol=1e-4, rtol=1e-4)

    # bf16 MXU-operand path (f32 accumulation; elementwise dtype picked per chip).
    out_bf16 = jax.block_until_ready(over_proj_net_l(x_big, params, use_bf16=True))
    assert out_bf16.shape == (300, 1), out_bf16.shape
    assert jnp.allclose(out_bf16, ref_big, atol=1e-1, rtol=1e-1)

    print("KERNEL_OK")
</pallas_src>

<mosaic_0001>
module attributes {stable_mosaic.version = 11 : i64} {
  func.func @_mlp_kernel(%arg0: i32, %arg1: memref<4x128xf32, #tpu.memory_space<vmem>>, %arg2: memref<16x4xf32, #tpu.memory_space<vmem>>, %arg3: memref<16x1xf32, #tpu.memory_space<vmem>>, %arg4: memref<64x16xf32, #tpu.memory_space<vmem>>, %arg5: memref<64x1xf32, #tpu.memory_space<vmem>>, %arg6: memref<128x64xf32, #tpu.memory_space<vmem>>, %arg7: memref<128x1xf32, #tpu.memory_space<vmem>>, %arg8: memref<64x128xf32, #tpu.memory_space<vmem>>, %arg9: memref<64x1xf32, #tpu.memory_space<vmem>>, %arg10: memref<16x64xf32, #tpu.memory_space<vmem>>, %arg11: memref<16x1xf32, #tpu.memory_space<vmem>>, %arg12: memref<1x16xf32, #tpu.memory_space<vmem>>, %arg13: memref<1x1xf32, #tpu.memory_space<vmem>>, %arg14: memref<1x128xf32, #tpu.memory_space<vmem>>) attributes {dimension_semantics = [#tpu.dimension_semantics<parallel>], iteration_bounds = array<i64: 1>, scalar_prefetch = 0 : i64, scratch_operands = 0 : i64, tpu.core_type = #tpu.core_type<tc>, window_params = [{transform_indices = @transform_0, window_bounds = array<i64: 4, 128>}, {pipeline_mode = #tpu.pipeline_mode<synchronous>, transform_indices = @transform_1, window_bounds = array<i64: 16, 4>}, {pipeline_mode = #tpu.pipeline_mode<synchronous>, transform_indices = @transform_2, window_bounds = array<i64: 16, 1>}, {pipeline_mode = #tpu.pipeline_mode<synchronous>, transform_indices = @transform_3, window_bounds = array<i64: 64, 16>}, {pipeline_mode = #tpu.pipeline_mode<synchronous>, transform_indices = @transform_4, window_bounds = array<i64: 64, 1>}, {pipeline_mode = #tpu.pipeline_mode<synchronous>, transform_indices = @transform_5, window_bounds = array<i64: 128, 64>}, {pipeline_mode = #tpu.pipeline_mode<synchronous>, transform_indices = @transform_6, window_bounds = array<i64: 128, 1>}, {pipeline_mode = #tpu.pipeline_mode<synchronous>, transform_indices = @transform_7, window_bounds = array<i64: 64, 128>}, {pipeline_mode = #tpu.pipeline_mode<synchronous>, transform_indices = @transform_8, window_bounds = array<i64: 64, 1>}, {pipeline_mode = #tpu.pipeline_mode<synchronous>, transform_indices = @transform_9, window_bounds = array<i64: 16, 64>}, {pipeline_mode = #tpu.pipeline_mode<synchronous>, transform_indices = @transform_10, window_bounds = array<i64: 16, 1>}, {pipeline_mode = #tpu.pipeline_mode<synchronous>, transform_indices = @transform_11, window_bounds = array<i64: 1, 16>}, {pipeline_mode = #tpu.pipeline_mode<synchronous>, transform_indices = @transform_12, window_bounds = array<i64: 1, 1>}, {transform_indices = @transform_13, window_bounds = array<i64: 1, 128>}]} {
    %c0 = arith.constant 0 : index
    %c0_0 = arith.constant 0 : index
    %0 = vector.load %arg3[%c0, %c0_0] : memref<16x1xf32, #tpu.memory_space<vmem>>, vector<16x1xf32>
    %c0_1 = arith.constant 0 : index
    %c0_2 = arith.constant 0 : index
    %1 = vector.load %arg5[%c0_1, %c0_2] : memref<64x1xf32, #tpu.memory_space<vmem>>, vector<64x1xf32>
    %c0_3 = arith.constant 0 : index
    %c0_4 = arith.constant 0 : index
    %2 = vector.load %arg7[%c0_3, %c0_4] : memref<128x1xf32, #tpu.memory_space<vmem>>, vector<128x1xf32>
    %c0_5 = arith.constant 0 : index
    %c0_6 = arith.constant 0 : index
    %3 = vector.load %arg9[%c0_5, %c0_6] : memref<64x1xf32, #tpu.memory_space<vmem>>, vector<64x1xf32>
    %c0_7 = arith.constant 0 : index
    %c0_8 = arith.constant 0 : index
    %4 = vector.load %arg11[%c0_7, %c0_8] : memref<16x1xf32, #tpu.memory_space<vmem>>, vector<16x1xf32>
    %c0_9 = arith.constant 0 : index
    %c0_10 = arith.constant 0 : index
    %5 = vector.load %arg13[%c0_9, %c0_10] : memref<1x1xf32, #tpu.memory_space<vmem>>, vector<1x1xf32>
    %c0_11 = arith.constant 0 : index
    %c0_12 = arith.constant 0 : index
    %6 = vector.load %arg2[%c0_11, %c0_12] : memref<16x4xf32, #tpu.memory_space<vmem>>, vector<16x4xf32>
    %c0_13 = arith.constant 0 : index
    %c0_14 = arith.constant 0 : index
    %7 = vector.load %arg1[%c0_13, %c0_14] : memref<4x128xf32, #tpu.memory_space<vmem>>, vector<4x128xf32>
    %cst = arith.constant dense<0.000000e+00> : vector<16x128xf32>
    %8 = tpu.matmul %6, %7, %cst {dimension_numbers = #tpu.dot_dimension_numbers<[1], [0], [0], [1], [0, 0, 1, 1], [], []>} : vector<16x4xf32>, vector<4x128xf32>, vector<16x128xf32> -> vector<16x128xf32>
    %9 = vector.broadcast %0 : vector<16x1xf32> to vector<16x128xf32>
    %10 = arith.addf %8, %9 : vector<16x128xf32>
    %cst_15 = arith.constant 0.000000e+00 : f32
    %11 = vector.broadcast %cst_15 : f32 to vector<16x128xf32>
    %12 = arith.maximumf %10, %11 : vector<16x128xf32>
    %c0_16 = arith.constant 0 : index
    %c0_17 = arith.constant 0 : index
    %13 = vector.load %arg4[%c0_16, %c0_17] : memref<64x16xf32, #tpu.memory_space<vmem>>, vector<64x16xf32>
    %cst_18 = arith.constant dense<0.000000e+00> : vector<64x128xf32>
    %14 = tpu.matmul %13, %12, %cst_18 {dimension_numbers = #tpu.dot_dimension_numbers<[1], [0], [0], [1], [0, 0, 1, 1], [], []>} : vector<64x16xf32>, vector<16x128xf32>, vector<64x128xf32> -> vector<64x128xf32>
    %15 = vector.broadcast %1 : vector<64x1xf32> to vector<64x128xf32>
    %16 = arith.addf %14, %15 : vector<64x128xf32>
    %cst_19 = arith.constant 0.000000e+00 : f32
    %17 = vector.broadcast %cst_19 : f32 to vector<64x128xf32>
    %18 = arith.maximumf %16, %17 : vector<64x128xf32>
    %c0_20 = arith.constant 0 : index
    %c0_21 = arith.constant 0 : index
    %19 = vector.load %arg6[%c0_20, %c0_21] : memref<128x64xf32, #tpu.memory_space<vmem>>, vector<128x64xf32>
    %cst_22 = arith.constant dense<0.000000e+00> : vector<128x128xf32>
    %20 = tpu.matmul %19, %18, %cst_22 {dimension_numbers = #tpu.dot_dimension_numbers<[1], [0], [0], [1], [0, 0, 1, 1], [], []>} : vector<128x64xf32>, vector<64x128xf32>, vector<128x128xf32> -> vector<128x128xf32>
    %21 = vector.broadcast %2 : vector<128x1xf32> to vector<128x128xf32>
    %22 = arith.addf %20, %21 : vector<128x128xf32>
    %cst_23 = arith.constant 0.000000e+00 : f32
    %23 = vector.broadcast %cst_23 : f32 to vector<128x128xf32>
    %24 = arith.maximumf %22, %23 : vector<128x128xf32>
    %c0_24 = arith.constant 0 : index
    %c0_25 = arith.constant 0 : index
    %25 = vector.load %arg8[%c0_24, %c0_25] : memref<64x128xf32, #tpu.memory_space<vmem>>, vector<64x128xf32>
    %cst_26 = arith.constant dense<0.000000e+00> : vector<64x128xf32>
    %26 = tpu.matmul %25, %24, %cst_26 {dimension_numbers = #tpu.dot_dimension_numbers<[1], [0], [0], [1], [0, 0, 1, 1], [], []>} : vector<64x128xf32>, vector<128x128xf32>, vector<64x128xf32> -> vector<64x128xf32>
    %27 = vector.broadcast %3 : vector<64x1xf32> to vector<64x128xf32>
    %28 = arith.addf %26, %27 : vector<64x128xf32>
    %cst_27 = arith.constant 0.000000e+00 : f32
    %29 = vector.broadcast %cst_27 : f32 to vector<64x128xf32>
    %30 = arith.maximumf %28, %29 : vector<64x128xf32>
    %c0_28 = arith.constant 0 : index
    %c0_29 = arith.constant 0 : index
    %31 = vector.load %arg10[%c0_28, %c0_29] : memref<16x64xf32, #tpu.memory_space<vmem>>, vector<16x64xf32>
    %cst_30 = arith.constant dense<0.000000e+00> : vector<16x128xf32>
    %32 = tpu.matmul %31, %30, %cst_30 {dimension_numbers = #tpu.dot_dimension_numbers<[1], [0], [0], [1], [0, 0, 1, 1], [], []>} : vector<16x64xf32>, vector<64x128xf32>, vector<16x128xf32> -> vector<16x128xf32>
    %33 = vector.broadcast %4 : vector<16x1xf32> to vector<16x128xf32>
    %34 = arith.addf %32, %33 : vector<16x128xf32>
    %cst_31 = arith.constant 0.000000e+00 : f32
    %35 = vector.broadcast %cst_31 : f32 to vector<16x128xf32>
    %36 = arith.maximumf %34, %35 : vector<16x128xf32>
    %c0_32 = arith.constant 0 : index
    %c0_33 = arith.constant 0 : index
    %37 = vector.load %arg12[%c0_32, %c0_33] : memref<1x16xf32, #tpu.memory_space<vmem>>, vector<1x16xf32>
    %cst_34 = arith.constant dense<0.000000e+00> : vector<1x128xf32>
    %38 = tpu.matmul %37, %36, %cst_34 {dimension_numbers = #tpu.dot_dimension_numbers<[1], [0], [0], [1], [0, 0, 1, 1], [], []>} : vector<1x16xf32>, vector<16x128xf32>, vector<1x128xf32> -> vector<1x128xf32>
    %39 = vector.broadcast %5 : vector<1x1xf32> to vector<1x128xf32>
    %40 = arith.addf %38, %39 : vector<1x128xf32>
    %c0_35 = arith.constant 0 : index
    %c0_36 = arith.constant 0 : index
    %41 = vector.load %arg14[%c0_35, %c0_36] : memref<1x128xf32, #tpu.memory_space<vmem>>, vector<1x128xf32>
    tpu.vector_store %arg14[%c0_35, %c0_36], %40 {strides = array<i32>} : memref<1x128xf32, #tpu.memory_space<vmem>>, vector<1x128xf32>,
    return
  }
  func.func @transform_0(%arg0: i32) -> (i32, i32) {
    %c0_i32 = arith.constant 0 : i32
    %c0_i32_0 = arith.constant 0 : i32
    return %c0_i32, %arg0 : i32, i32
  }
  func.func @transform_1(%arg0: i32) -> (i32, i32) {
    %c0_i32 = arith.constant 0 : i32
    %c0_i32_0 = arith.constant 0 : i32
    %c0_i32_1 = arith.constant 0 : i32
    return %c0_i32, %c0_i32_0 : i32, i32
  }
  func.func @transform_2(%arg0: i32) -> (i32, i32) {
    %c0_i32 = arith.constant 0 : i32
    %c0_i32_0 = arith.constant 0 : i32
    %c0_i32_1 = arith.constant 0 : i32
    return %c0_i32, %c0_i32_0 : i32, i32
  }
  func.func @transform_3(%arg0: i32) -> (i32, i32) {
    %c0_i32 = arith.constant 0 : i32
    %c0_i32_0 = arith.constant 0 : i32
    %c0_i32_1 = arith.constant 0 : i32
    return %c0_i32, %c0_i32_0 : i32, i32
  }
  func.func @transform_4(%arg0: i32) -> (i32, i32) {
    %c0_i32 = arith.constant 0 : i32
    %c0_i32_0 = arith.constant 0 : i32
    %c0_i32_1 = arith.constant 0 : i32
    return %c0_i32, %c0_i32_0 : i32, i32
  }
  func.func @transform_5(%arg0: i32) -> (i32, i32) {
    %c0_i32 = arith.constant 0 : i32
    %c0_i32_0 = arith.constant 0 : i32
    %c0_i32_1 = arith.constant 0 : i32
    return %c0_i32, %c0_i32_0 : i32, i32
  }
  func.func @transform_6(%arg0: i32) -> (i32, i32) {
    %c0_i32 = arith.constant 0 : i32
    %c0_i32_0 = arith.constant 0 : i32
    %c0_i32_1 = arith.constant 0 : i32
    return %c0_i32, %c0_i32_0 : i32, i32
  }
  func.func @transform_7(%arg0: i32) -> (i32, i32) {
    %c0_i32 = arith.constant 0 : i32
    %c0_i32_0 = arith.constant 0 : i32
    %c0_i32_1 = arith.constant 0 : i32
    return %c0_i32, %c0_i32_0 : i32, i32
  }
  func.func @transform_8(%arg0: i32) -> (i32, i32) {
    %c0_i32 = arith.constant 0 : i32
    %c0_i32_0 = arith.constant 0 : i32
    %c0_i32_1 = arith.constant 0 : i32
    return %c0_i32, %c0_i32_0 : i32, i32
  }
  func.func @transform_9(%arg0: i32) -> (i32, i32) {
    %c0_i32 = arith.constant 0 : i32
    %c0_i32_0 = arith.constant 0 : i32
    %c0_i32_1 = arith.constant 0 : i32
    return %c0_i32, %c0_i32_0 : i32, i32
  }
  func.func @transform_10(%arg0: i32) -> (i32, i32) {
    %c0_i32 = arith.constant 0 : i32
    %c0_i32_0 = arith.constant 0 : i32
    %c0_i32_1 = arith.constant 0 : i32
    return %c0_i32, %c0_i32_0 : i32, i32
  }
  func.func @transform_11(%arg0: i32) -> (i32, i32) {
    %c0_i32 = arith.constant 0 : i32
    %c0_i32_0 = arith.constant 0 : i32
    %c0_i32_1 = arith.constant 0 : i32
    return %c0_i32, %c0_i32_0 : i32, i32
  }
  func.func @transform_12(%arg0: i32) -> (i32, i32) {
    %c0_i32 = arith.constant 0 : i32
    %c0_i32_0 = arith.constant 0 : i32
    %c0_i32_1 = arith.constant 0 : i32
    return %c0_i32, %c0_i32_0 : i32, i32
  }
  func.func @transform_13(%arg0: i32) -> (i32, i32) {
    %c0_i32 = arith.constant 0 : i32
    %c0_i32_0 = arith.constant 0 : i32
    return %c0_i32, %arg0 : i32, i32
  }
}

</mosaic_0001>

<bundles_post_ra>
// kernel: tpu_custom_call.1
= control target key start
LH: loop header
LB: loop body
LE: loop exit
PB: predicated region body
PF: predicated region fallthrough
CT: control target
= control target key end

     0   :  { %s1089_s0 = inlined_call_operand.vmem [shape: f32[4,8], index: 0, kind: input, shape index: {}]   ;;  %s1090_s1 = inlined_call_operand.vmem [shape: f32[16,4], index: 1, kind: input, shape index: {}]   ;;  %s1091_s2 = inlined_call_operand.vmem [shape: f32[16,1], index: 2, kind: input, shape index: {}]   ;;  %s1092_s3 = inlined_call_operand.vmem [shape: f32[64,16], index: 3, kind: input, shape index: {}]   ;;  %s1093_s4 = inlined_call_operand.vmem [shape: f32[64,1], index: 4, kind: input, shape index: {}]   ;;  %s1094_s5 = inlined_call_operand.vmem [shape: f32[128,64], index: 5, kind: input, shape index: {}]   ;;  %s1095_s6 = inlined_call_operand.vmem [shape: f32[128,1], index: 6, kind: input, shape index: {}]   ;;  %s1096_s7 = inlined_call_operand.vmem [shape: f32[64,128], index: 7, kind: input, shape index: {}]   ;;  %s1097_s8 = inlined_call_operand.vmem [shape: f32[64,1], index: 8, kind: input, shape index: {}]   ;;  %s1098_s9 = inlined_call_operand.vmem [shape: f32[16,64], index: 9, kind: input, shape index: {}]   ;;  %s1099_s10 = inlined_call_operand.vmem [shape: f32[16,1], index: 10, kind: input, shape index: {}]   ;;  %s1100_s11 = inlined_call_operand.vmem [shape: f32[1,16], index: 11, kind: input, shape index: {}]   ;;  %s1101_s12 = inlined_call_operand.<no memory space> [shape: f32[1,1], index: 12, kind: input, shape index: {}]   ;;  %s1102_s13 = inlined_call_operand.hbm [shape: f32[1,8], index: 13, kind: output, shape index: {}]  }
   0x1   :  { %v18_v0 = vstv %s1101_s12 }
   0x2   :  { %19 = vst [vmem:[#allocation2] sm:$0x1] %v18_v0 }
   0x3   :  { %v86_v1 = vld [vmem:[%s1089_s0] sm:$0xf]  ;;  %vm104_vm0 = vcmask 1043456   ;;  %vm97_vm1 = vcmask 31744   ;;  %v753_v3 = vmov 0   ;;  %v48_v4 = vld [vmem:[%s1091_s2 + $0x8] sm:$0xff] }
   0x4   :  { %v84_v2 = vld [vmem:[%s1090_s1] sm:$0xff]  ;;  %724 = vset.pattern.permute.xlu0 %v753_v3  ;;  %668 = vmatpush.msk.msra.mxu0 %vm104_vm0, %v86_v1 }
   0x5   :  { %669 = vmatmul.msk.f32.vlgmr.msra.gmra.mxu0 %vm97_vm1, %v84_v2  ;;  %94 = vperm.xlu0 %724, %v48_v4  }
   0x6   :  { %725 = vset.pattern.permute.xlu1 %v753_v3  ;;  %726 = vset.pattern.permute.xlu2 %v753_v3 }
   0x7   :  { %20 = vsyncpa [#allocation4], 0  ;;  %v85_v5 = vld [vmem:[%s1090_s1 + $0x8] sm:$0xff]  ;;  %v47_v6 = vld [vmem:[%s1091_s2] sm:$0xff]  ;;  %vm181_vm2 = vcmask 130048   ;;  %vm351_vm3 = vcmask 523264  }
   0x8   :  { %v52_v7 = vld [vmem:[%s1093_s4 + $0x18] sm:$0xff]  ;;  %v49_v8 = vld [vmem:[%s1093_s4] sm:$0xff]  ;;  %v70_v9 = vld [vmem:[%s1095_s6 + $0x68] sm:$0xff]  ;;  %s659_s0 = sshll.u32 %s1102_s13, 4  ;;  %s660_s0 = int_to_ptr.hbm [resolvable:$true] %s659_s0 }
   0x9   :  { %v67_v10 = vld [vmem:[%s1095_s6 + $0x50] sm:$0xff]  ;;  %v64_v11 = vld [vmem:[%s1095_s6 + $0x38] sm:$0xff]  ;;  %v61_v12 = vld [vmem:[%s1095_s6 + $0x20] sm:$0xff] }
   0xa   :  { %v58_v13 = vld [vmem:[%s1095_s6 + $0x8] sm:$0xff]  ;;  %v56_v14 = vld [vmem:[%s1093_s4 + $0x38] sm:$0xff]  ;;  %v79_v15 = vld [vmem:[%s1097_s8 + $0x30] sm:$0xff] }
   0xb   :  { %178 = vperm.xlu1 %725, %v56_v14   ;;  %v76_v16 = vld [vmem:[%s1097_s8 + $0x18] sm:$0xff]  ;;  %v55_v17 = vld [vmem:[%s1093_s4 + $0x30] sm:$0xff]  ;;  %v73_v18 = vld [vmem:[%s1097_s8] sm:$0xff] }
   0xc   :  { %v83_v19 = vld [vmem:[#allocation2] sm:$0x1]  ;;  %v51_v20 = vld [vmem:[%s1093_s4 + $0x10] sm:$0xff]  ;;  %v72_v21 = vld [vmem:[%s1095_s6 + $0x78] sm:$0xff] }
   0xd   :  { %670 = vmatmul.msk.f32.gmra.mxu0 %vm97_vm1, %v85_v5  ;;  %89 = vperm.xlu0 %724, %v47_v6   ;;  %v54_v22 = vld [vmem:[%s1093_s4 + $0x28] sm:$0xff]  ;;  %v69_v23 = vld [vmem:[%s1095_s6 + $0x60] sm:$0xff]  ;;  %v63_v29 = vld [vmem:[%s1095_s6 + $0x30] sm:$0xff] }
   0xe   :  { %168 = vperm.xlu2 %726, %v54_v22   ;;  %v53_v24 = vld [vmem:[%s1093_s4 + $0x20] sm:$0xff]  ;;  %v66_v25 = vld [vmem:[%s1095_s6 + $0x48] sm:$0xff]  ;;  %v71_v30 = vld [vmem:[%s1095_s6 + $0x70] sm:$0xff] }
   0xf   :  { %v50_v26 = vld [vmem:[%s1093_s4 + $0x8] sm:$0xff]  ;;  %v60_v35 = vld [vmem:[%s1095_s6 + $0x18] sm:$0xff]  ;;  %v133_v38 = vld [vmem:[%s1092_s3] sm:$0xff] }
  0x10   :  { %v68_v39 = vld [vmem:[%s1095_s6 + $0x58] sm:$0xff]  ;;  %v57_v40 = vld [vmem:[%s1095_s6] sm:$0xff]  ;;  %v134_v41 = vld [vmem:[%s1092_s3 + $0x8] sm:$0xff] }
  0x11   :  { %v65_v42 = vld [vmem:[%s1095_s6 + $0x40] sm:$0xff]  ;;  %v78_v43 = vld [vmem:[%s1097_s8 + $0x28] sm:$0xff]  ;;  %v135_v44 = vld [vmem:[%s1092_s3 + $0x10] sm:$0xff] }
  0x12   :  { %v62_v45 = vld [vmem:[%s1095_s6 + $0x28] sm:$0xff]  ;;  %v75_v46 = vld [vmem:[%s1097_s8 + $0x10] sm:$0xff]  ;;  %v136_v47 = vld [vmem:[%s1092_s3 + $0x18] sm:$0xff] }
  0x13   :  { %173 = vperm.xlu1 %725, %v55_v17   ;;  %v59_v48 = vld [vmem:[%s1095_s6 + $0x10] sm:$0xff]  ;;  %v82_v49 = vld [vmem:[%s1099_s10 + $0x8] sm:$0xff]  ;;  %v137_v50 = vld [vmem:[%s1092_s3 + $0x20] sm:$0xff] }
  0x14   :  { %v80_v51 = vld [vmem:[%s1097_s8 + $0x38] sm:$0xff]  ;;  %v138_v52 = vld [vmem:[%s1092_s3 + $0x28] sm:$0xff]  ;;  %v77_v53 = vld [vmem:[%s1097_s8 + $0x20] sm:$0xff] }
  0x15   :  { %158 = vperm.xlu0 %724, %v52_v7   ;;  %v74_v54 = vld [vmem:[%s1097_s8 + $0x8] sm:$0xff]  ;;  %v139_v55 = vld [vmem:[%s1092_s3 + $0x30] sm:$0xff]  ;;  %v81_v56 = vld [vmem:[%s1099_s10] sm:$0xff] }
  0x16   :  { %163 = vperm.xlu2 %726, %v53_v24   ;;  %v140_v57 = vld [vmem:[%s1092_s3 + $0x38] sm:$0xff] }
  0x1b   :  { %153 = vperm.xlu1 %725, %v51_v20  }
  0x1d   :  { %143 = vperm.xlu0 %724, %v49_v8  }
  0x1e   :  { %148 = vperm.xlu2 %726, %v50_v26   ;;  %v255_v26 = vld [vmem:[%s1094_s5] sm:$0xff] }
  0x23   :  { %348 = vperm.xlu1 %725, %v72_v21  }
  0x25   :  { %338 = vperm.xlu0 %724, %v70_v9  }
  0x26   :  { %343 = vperm.xlu2 %726, %v71_v30   ;;  %v257_v30 = vld [vmem:[%s1094_s5 + $0x10] sm:$0xff] }
  0x2b   :  { %333 = vperm.xlu1 %725, %v69_v23  }
  0x2d   :  { %323 = vperm.xlu0 %724, %v67_v10  }
  0x2e   :  { %328 = vperm.xlu2 %726, %v68_v39   ;;  %v268_v39 = vld [vmem:[%s1094_s5 + $0x68] sm:$0xff] }
  0x33   :  { %318 = vperm.xlu1 %725, %v66_v25  }
  0x35   :  { %308 = vperm.xlu0 %724, %v64_v11  }
  0x36   :  { %313 = vperm.xlu2 %726, %v65_v42  }
  0x3b   :  { %303 = vperm.xlu1 %725, %v63_v29   ;;  %v263_v29 = vld [vmem:[%s1094_s5 + $0x40] sm:$0xff] }
  0x3d   :  { %293 = vperm.xlu0 %724, %v61_v12  }
  0x3e   :  { %298 = vperm.xlu2 %726, %v62_v45  }
  0x43   :  { %288 = vperm.xlu1 %725, %v60_v35   ;;  %v266_v35 = vld [vmem:[%s1094_s5 + $0x58] sm:$0xff] }
  0x45   :  { %278 = vperm.xlu0 %724, %v58_v13  }
  0x46   :  { %283 = vperm.xlu2 %726, %v59_v48  }
  0x4b   :  { %273 = vperm.xlu1 %725, %v57_v40   ;;  %v269_v40 = vld [vmem:[%s1094_s5 + $0x70] sm:$0xff] }
  0x4d   :  { %521 = vperm.xlu0 %724, %v79_v15  }
  0x4e   :  { %526 = vperm.xlu2 %726, %v80_v51  }
  0x53   :  { %516 = vperm.xlu1 %725, %v78_v43  }
  0x55   :  { %506 = vperm.xlu0 %724, %v76_v16  }
  0x56   :  { %511 = vperm.xlu2 %726, %v77_v53  }
  0x5b   :  { %501 = vperm.xlu1 %725, %v75_v46  }
  0x5d   :  { %491 = vperm.xlu0 %724, %v73_v18  }
  0x5e   :  { %496 = vperm.xlu2 %726, %v74_v54  }
  0x63   :  { %587 = vperm.xlu1 %725, %v82_v49  }
  0x65   :  { %624 = vperm.xlu0 %724, %v83_v19  }
  0x66   :  { %582 = vperm.xlu2 %726, %v81_v56  }
  0x68   :  { %v169_v1 = vpop.permute.xlu2 %168 }
  0x70   :  { %v164_v4 = vpop.permute.xlu2 %163 }
  0x77   :  { %v95_v27 = vpop.permute.xlu0 %94 }
  0x78   :  { %v149_v18 = vpop.permute.xlu2 %148 }
  0x7d   :  { %v179_v0 = vpop.permute.xlu1 %178 }
  0x7f   :  { %v90_v31 = vpop.permute.xlu0 %89 }
  0x82   :  { %v125_v28 = vpop.f32.mrf.mxu0 }
  0x83   :  { %v126_v33 = vadd.f32 %v125_v28, %v90_v31  ;;  %v256_v28 = vld [vmem:[%s1094_s5 + $0x8] sm:$0xff] }
  0x84   :  { %v264_v31 = vld [vmem:[%s1094_s5 + $0x48] sm:$0xff] }
  0x85   :  { %v131_v37 = vmax.f32 %v126_v33, 0.0  ;;  %v174_v3 = vpop.permute.xlu1 %173  ;;  %v265_v33 = vld [vmem:[%s1094_s5 + $0x50] sm:$0xff] }
  0x87   :  { %v159_v8 = vpop.permute.xlu0 %158 }
  0x8a   :  { %v128_v32 = vpop.f32.mrf.mxu0 }
  0x8b   :  { %v129_v34 = vadd.f32 %v128_v32, %v95_v27  ;;  %v262_v27 = vld [vmem:[%s1094_s5 + $0x38] sm:$0xff] }
  0x8c   :  { %v258_v32 = vld [vmem:[%s1094_s5 + $0x18] sm:$0xff] }
  0x8d   :  { %v132_v36 = vmax.f32 %v129_v34, 0.0  ;;  %v154_v15 = vpop.permute.xlu1 %153  ;;  %v259_v34 = vld [vmem:[%s1094_s5 + $0x20] sm:$0xff] }
  0x8f   :  { %220 = vmatpush.msra.mxu1 %v132_v36  ;;  %v144_v21 = vpop.permute.xlu0 %143  ;;  %v260_v36 = vld [vmem:[%s1094_s5 + $0x28] sm:$0xff] }
  0x91   :  { %221 = vmatpush.msra.mxu1 %v131_v37  ;;  %v267_v37 = vld [vmem:[%s1094_s5 + $0x60] sm:$0xff] }
  0x92   :  { %671 = vmatmul.msk.f32.vlgmr.msra.gmra.mxu1 %vm181_vm2, %v133_v38  ;;  %v261_v38 = vld [vmem:[%s1094_s5 + $0x30] sm:$0xff] }
  0x95   :  { %v349_v51 = vpop.permute.xlu1 %348 }
  0x9a   :  { %672 = vmatmul.msk.f32.gmra.mxu1 %vm181_vm2, %v134_v41  ;;  %v270_v41 = vld [vmem:[%s1094_s5 + $0x78] sm:$0xff] }
  0x9d   :  { %v334_v56 = vpop.permute.xlu1 %333 }
  0xa2   :  { %673 = vmatmul.msk.f32.gmra.mxu1 %vm181_vm2, %v135_v44 }
  0xaa   :  { %674 = vmatmul.msk.f32.gmra.mxu1 %vm181_vm2, %v136_v47 }
  0xb2   :  { %675 = vmatmul.msk.f32.gmra.mxu1 %vm181_vm2, %v137_v50 }
  0xba   :  { %676 = vmatmul.msk.f32.gmra.mxu1 %vm181_vm2, %v138_v52  ;;  %v344_v52 = vpop.permute.xlu2 %343 }
  0xc2   :  { %677 = vmatmul.msk.f32.gmra.mxu1 %vm181_vm2, %v139_v55  ;;  %v339_v55 = vpop.permute.xlu0 %338 }
  0xca   :  { %678 = vmatmul.msk.f32.gmra.mxu1 %vm181_vm2, %v140_v57 }
 0x10f   :  { %v223_v58 = vpop.f32.mrf.mxu1 }
 0x110   :  { %v224_v22 = vadd.f32 %v223_v58, %v144_v21  ;;  %v329_v58 = vpop.permute.xlu2 %328 }
 0x112   :  { %v247_v25 = vmax.f32 %v224_v22, 0.0 }
 0x117   :  { %v226_v59 = vpop.f32.mrf.mxu1 }
 0x118   :  { %v227_v19 = vadd.f32 %v226_v59, %v149_v18 }
 0x11a   :  { %v248_v24 = vmax.f32 %v227_v19, 0.0 }
 0x11f   :  { %v229_v60 = vpop.f32.mrf.mxu1 }
 0x120   :  { %v230_v16 = vadd.f32 %v229_v60, %v154_v15  ;;  %v324_v60 = vpop.permute.xlu0 %323 }
 0x122   :  { %v249_v23 = vmax.f32 %v230_v16, 0.0 }
 0x127   :  { %v232_v61 = vpop.f32.mrf.mxu1 }
 0x128   :  { %v233_v13 = vadd.f32 %v232_v61, %v159_v8  ;;  %v319_v61 = vpop.permute.xlu1 %318 }
 0x12a   :  { %v250_v20 = vmax.f32 %v233_v13, 0.0 }
 0x12f   :  { %v235_v62 = vpop.f32.mrf.mxu1 }
 0x130   :  { %v236_v11 = vadd.f32 %v235_v62, %v164_v4 }
 0x132   :  { %v251_v17 = vmax.f32 %v236_v11, 0.0 }
 0x137   :  { %v238_v63 = vpop.f32.mrf.mxu1 }
 0x138   :  { %v239_v9 = vadd.f32 %v238_v63, %v169_v1 }
 0x13a   :  { %v252_v14 = vmax.f32 %v239_v9, 0.0 }
 0x13f   :  { %v241_v2 = vpop.f32.mrf.mxu1 }
 0x140   :  { %v242_v6 = vadd.f32 %v241_v2, %v174_v3  ;;  %v314_v3 = vpop.permute.xlu2 %313 }
 0x142   :  { %v253_v12 = vmax.f32 %v242_v6, 0.0 }
 0x147   :  { %v244_v5 = vpop.f32.mrf.mxu1 }
 0x148   :  { %v245_v7 = vadd.f32 %v244_v5, %v179_v0 }
 0x14a   :  { %v254_v10 = vmax.f32 %v245_v7, 0.0  ;;  %v309_v7 = vpop.permute.xlu0 %308 }
 0x14c   :  { %408 = vmatpush.msrb.mxu0 %v254_v10  ;;  %698 = vmatpush.msra.mxu2 %v254_v10  ;;  %v304_v10 = vpop.permute.xlu1 %303 }
 0x14e   :  { %409 = vmatpush.msrb.mxu0 %v253_v12  ;;  %699 = vmatpush.msra.mxu2 %v253_v12 }
 0x150   :  { %410 = vmatpush.msrb.mxu0 %v252_v14  ;;  %700 = vmatpush.msra.mxu2 %v252_v14 }
 0x152   :  { %411 = vmatpush.msrb.mxu0 %v251_v17  ;;  %701 = vmatpush.msra.mxu2 %v251_v17  ;;  %v299_v17 = vpop.permute.xlu2 %298  ;;  %v294_v21 = vpop.permute.xlu0 %293 }
 0x154   :  { %412 = vmatpush.msrb.mxu0 %v250_v20  ;;  %702 = vmatpush.msra.mxu2 %v250_v20 }
 0x156   :  { %413 = vmatpush.msrb.mxu0 %v249_v23  ;;  %703 = vmatpush.msra.mxu2 %v249_v23 }
 0x158   :  { %414 = vmatpush.msrb.mxu0 %v248_v24  ;;  %704 = vmatpush.msra.mxu2 %v248_v24  ;;  %v289_v24 = vpop.permute.xlu1 %288 }
 0x15a   :  { %415 = vmatpush.msrb.mxu0 %v247_v25  ;;  %705 = vmatpush.msra.mxu2 %v247_v25 }
 0x15b   :  { %679 = vmatmul.msk.f32.vlgmr.msrb.gmra.mxu0 %vm351_vm3, %v255_v26  ;;  %686 = vmatmul.msk.f32.vlgmr.msra.gmra.mxu2 %vm351_vm3, %v262_v27 }
 0x163   :  { %680 = vmatmul.msk.f32.gmra.mxu0 %vm351_vm3, %v256_v28  ;;  %687 = vmatmul.msk.f32.gmra.mxu2 %vm351_vm3, %v263_v29 }
 0x16b   :  { %681 = vmatmul.msk.f32.gmra.mxu0 %vm351_vm3, %v257_v30  ;;  %688 = vmatmul.msk.f32.gmra.mxu2 %vm351_vm3, %v264_v31  ;;  %v284_v31 = vpop.permute.xlu2 %283 }
 0x173   :  { %682 = vmatmul.msk.f32.gmra.mxu0 %vm351_vm3, %v258_v32  ;;  %689 = vmatmul.msk.f32.gmra.mxu2 %vm351_vm3, %v265_v33 }
 0x17b   :  { %683 = vmatmul.msk.f32.gmra.mxu0 %vm351_vm3, %v259_v34  ;;  %690 = vmatmul.msk.f32.gmra.mxu2 %vm351_vm3, %v266_v35  ;;  %v279_v34 = vpop.permute.xlu0 %278 }
 0x183   :  { %684 = vmatmul.msk.f32.gmra.mxu0 %vm351_vm3, %v260_v36  ;;  %691 = vmatmul.msk.f32.gmra.mxu2 %vm351_vm3, %v267_v37  ;;  %v274_v37 = vpop.permute.xlu1 %273 }
 0x18b   :  { %685 = vmatmul.msk.f32.gmra.mxu0 %vm351_vm3, %v261_v38  ;;  %692 = vmatmul.msk.f32.gmra.mxu2 %vm351_vm3, %v268_v39 }
 0x193   :  { %693 = vmatmul.msk.f32.gmra.mxu2 %vm351_vm3, %v269_v40 }
 0x19b   :  { %694 = vmatmul.msk.f32.gmra.mxu2 %vm351_vm3, %v270_v41 }
 0x1d8   :  { %v1041_v45 = vpop.f32.mrf.mxu0 }
 0x1d9   :  { %v418_v38 = vadd.f32 %v1041_v45, %v274_v37  ;;  %v484_v45 = vld [vmem:[%s1096_s7 + $0x18] sm:$0xff] }
 0x1db   :  { %v465_v41 = vmax.f32 %v418_v38, 0.0 }
 0x1de   :  { %v438_v42 = vpop.f32.mrf.mxu2 }
 0x1df   :  { %v439_v19 = vadd.f32 %v438_v42, %v309_v7  ;;  %v481_v42 = vld [vmem:[%s1096_s7] sm:$0xff] }
 0x1e0   :  { %v1043_v47 = vpop.f32.mrf.mxu0 }
 0x1e1   :  { %v472_v25 = vmax.f32 %v439_v19, 0.0  ;;  %v421_v35 = vadd.f32 %v1043_v47, %v279_v34  ;;  %v486_v47 = vld [vmem:[%s1096_s7 + $0x28] sm:$0xff] }
 0x1e2   :  { %v579_v19 = vld [vmem:[%s1098_s9 + $0x8] sm:$0xff] }
 0x1e3   :  { %v466_v40 = vmax.f32 %v421_v35, 0.0 }
 0x1e6   :  { %v441_v43 = vpop.f32.mrf.mxu2 }
 0x1e7   :  { %v442_v15 = vadd.f32 %v441_v43, %v314_v3  ;;  %v482_v43 = vld [vmem:[%s1096_s7 + $0x8] sm:$0xff] }
 0x1e8   :  { %v1045_v49 = vpop.f32.mrf.mxu0 }
 0x1e9   :  { %v473_v22 = vmax.f32 %v442_v15, 0.0  ;;  %v424_v32 = vadd.f32 %v1045_v49, %v284_v31  ;;  %v488_v49 = vld [vmem:[%s1096_s7 + $0x38] sm:$0xff] }
 0x1eb   :  { %v467_v39 = vmax.f32 %v424_v32, 0.0 }
 0x1ee   :  { %v444_v44 = vpop.f32.mrf.mxu2 }
 0x1ef   :  { %v445_v13 = vadd.f32 %v444_v44, %v319_v61  ;;  %v483_v44 = vld [vmem:[%s1096_s7 + $0x10] sm:$0xff] }
 0x1f0   :  { %v426_v53 = vpop.f32.mrf.mxu0 }
 0x1f1   :  { %v474_v20 = vmax.f32 %v445_v13, 0.0  ;;  %v427_v29 = vadd.f32 %v426_v53, %v289_v24 }
 0x1f3   :  { %v468_v36 = vmax.f32 %v427_v29, 0.0 }
 0x1f6   :  { %v447_v46 = vpop.f32.mrf.mxu2 }
 0x1f7   :  { %v448_v11 = vadd.f32 %v447_v46, %v324_v60  ;;  %v485_v46 = vld [vmem:[%s1096_s7 + $0x20] sm:$0xff] }
 0x1f8   :  { %v429_v59 = vpop.f32.mrf.mxu0 }
 0x1f9   :  { %v475_v16 = vmax.f32 %v448_v11, 0.0  ;;  %v430_v27 = vadd.f32 %v429_v59, %v294_v21 }
 0x1fb   :  { %v469_v33 = vmax.f32 %v430_v27, 0.0 }
 0x1fe   :  { %v450_v48 = vpop.f32.mrf.mxu2 }
 0x1ff   :  { %v451_v8 = vadd.f32 %v450_v48, %v329_v58  ;;  %v487_v48 = vld [vmem:[%s1096_s7 + $0x30] sm:$0xff]  ;;  %v517_v58 = vpop.permute.xlu1 %516 }
 0x200   :  { %v432_v4 = vpop.f32.mrf.mxu0 }
 0x201   :  { %v476_v14 = vmax.f32 %v451_v8, 0.0  ;;  %v433_v26 = vadd.f32 %v432_v4, %v299_v17 }
 0x203   :  { %v470_v30 = vmax.f32 %v433_v26, 0.0 }
 0x206   :  { %v453_v50 = vpop.f32.mrf.mxu2 }
 0x207   :  { %v454_v5 = vadd.f32 %v453_v50, %v334_v56  ;;  %v522_v56 = vpop.permute.xlu0 %521 }
 0x208   :  { %v435_v18 = vpop.f32.mrf.mxu0 }
 0x209   :  { %v477_v12 = vmax.f32 %v454_v5, 0.0  ;;  %v436_v23 = vadd.f32 %v435_v18, %v304_v10  ;;  %v578_v18 = vld [vmem:[%s1098_s9] sm:$0xff]  ;;  %s754_s9 = smov [#allocation3]  }
 0x20a   :  { %s657_s3 = sshll.u32 %s754_s9, 4  ;;  %s658_s3 = int_to_ptr.vmem [resolvable:$true] %s657_s3 }
 0x20b   :  { %v471_v28 = vmax.f32 %v436_v23, 0.0 }
 0x20e   :  { %v456_v54 = vpop.f32.mrf.mxu2 }
 0x20f   :  { %v457_v1 = vadd.f32 %v456_v54, %v339_v55  ;;  %v527_v55 = vpop.permute.xlu2 %526 }
 0x211   :  { %v478_v9 = vmax.f32 %v457_v1, 0.0 }
 0x216   :  { %v459_v57 = vpop.f32.mrf.mxu2 }
 0x217   :  { %v460_v63 = vadd.f32 %v459_v57, %v344_v52  ;;  %v512_v59 = vpop.permute.xlu2 %511 }
 0x219   :  { %v479_v6 = vmax.f32 %v460_v63, 0.0  ;;  %v507_v63 = vpop.permute.xlu0 %506 }
 0x21e   :  { %v462_v62 = vpop.f32.mrf.mxu2 }
 0x21f   :  { %v463_v0 = vadd.f32 %v462_v62, %v349_v51 }
 0x221   :  { %v480_v2 = vmax.f32 %v463_v0, 0.0  ;;  %v492_v13 = vpop.permute.xlu0 %491 }
 0x223   :  { %529 = vmatpush.msra.mxu0 %v480_v2  ;;  %706 = vmatpush.msra.mxu3 %v480_v2 }
 0x225   :  { %530 = vmatpush.msra.mxu0 %v479_v6  ;;  %707 = vmatpush.msra.mxu3 %v479_v6  ;;  %v502_v6 = vpop.permute.xlu1 %501 }
 0x227   :  { %531 = vmatpush.msra.mxu0 %v478_v9  ;;  %708 = vmatpush.msra.mxu3 %v478_v9  ;;  %v497_v9 = vpop.permute.xlu2 %496 }
 0x229   :  { %532 = vmatpush.msra.mxu0 %v477_v12  ;;  %709 = vmatpush.msra.mxu3 %v477_v12  ;;  %v625_v29 = vpop.permute.xlu0 %624 }
 0x22b   :  { %533 = vmatpush.msra.mxu0 %v476_v14  ;;  %710 = vmatpush.msra.mxu3 %v476_v14 }
 0x22d   :  { %534 = vmatpush.msra.mxu0 %v475_v16  ;;  %711 = vmatpush.msra.mxu3 %v475_v16  ;;  %v588_v21 = vpop.permute.xlu1 %587 }
 0x22f   :  { %535 = vmatpush.msra.mxu0 %v474_v20  ;;  %712 = vmatpush.msra.mxu3 %v474_v20 }
 0x231   :  { %536 = vmatpush.msra.mxu0 %v473_v22  ;;  %713 = vmatpush.msra.mxu3 %v473_v22  ;;  %v583_v22 = vpop.permute.xlu2 %582 }
 0x233   :  { %537 = vmatpush.msra.mxu0 %v472_v25  ;;  %714 = vmatpush.msra.mxu3 %v472_v25 }
 0x235   :  { %538 = vmatpush.msra.mxu0 %v471_v28  ;;  %715 = vmatpush.msra.mxu3 %v471_v28  ;;  %v621_v28 = vld [vmem:[%s1100_s11] sm:$0x1] }
 0x237   :  { %539 = vmatpush.msra.mxu0 %v470_v30  ;;  %716 = vmatpush.msra.mxu3 %v470_v30  ;;  %v627_v30 = vperm.slane %v625_v29, 0 }
 0x239   :  { %540 = vmatpush.msra.mxu0 %v469_v33  ;;  %717 = vmatpush.msra.mxu3 %v469_v33 }
 0x23b   :  { %541 = vmatpush.msra.mxu0 %v468_v36  ;;  %718 = vmatpush.msra.mxu3 %v468_v36 }
 0x23d   :  { %542 = vmatpush.msra.mxu0 %v467_v39  ;;  %719 = vmatpush.msra.mxu3 %v467_v39 }
 0x23f   :  { %543 = vmatpush.msra.mxu0 %v466_v40  ;;  %720 = vmatpush.msra.mxu3 %v466_v40 }
 0x241   :  { %544 = vmatpush.msra.mxu0 %v465_v41  ;;  %721 = vmatpush.msra.mxu3 %v465_v41 }
 0x242   :  { %545 = vmatmul.f32.vlgmr.msra.gmra.mxu0 %v481_v42  ;;  %548 = vmatmul.f32.vlgmr.msra.gmra.mxu3 %v482_v43 }
 0x24a   :  { %551 = vmatmul.f32.gmra.mxu3 %v483_v44 }
 0x252   :  { %554 = vmatmul.f32.gmra.mxu3 %v484_v45 }
 0x25a   :  { %557 = vmatmul.f32.gmra.mxu3 %v485_v46 }
 0x262   :  { %560 = vmatmul.f32.gmra.mxu3 %v486_v47 }
 0x26a   :  { %563 = vmatmul.f32.gmra.mxu3 %v487_v48 }
 0x272   :  { %566 = vmatmul.f32.gmra.mxu3 %v488_v49 }
 0x2bf   :  { %v546_v10 = vpop.f32.mrf.mxu0 }
 0x2c0   :  { %v547_v14 = vadd.f32 %v546_v10, %v492_v13 }
 0x2c2   :  { %v570_v17 = vmax.f32 %v547_v14, 0.0 }
 0x2c5   :  { %v549_v50 = vpop.f32.mrf.mxu3 }
 0x2c6   :  { %v550_v11 = vadd.f32 %v549_v50, %v497_v9 }
 0x2c8   :  { %v571_v16 = vmax.f32 %v550_v11, 0.0 }
 0x2cd   :  { %v552_v51 = vpop.f32.mrf.mxu3 }
 0x2ce   :  { %v553_v7 = vadd.f32 %v552_v51, %v502_v6 }
 0x2d0   :  { %v572_v15 = vmax.f32 %v553_v7, 0.0 }
 0x2d5   :  { %v555_v52 = vpop.f32.mrf.mxu3 }
 0x2d6   :  { %v556_v4 = vadd.f32 %v555_v52, %v507_v63 }
 0x2d8   :  { %v573_v12 = vmax.f32 %v556_v4, 0.0 }
 0x2dd   :  { %v558_v53 = vpop.f32.mrf.mxu3 }
 0x2de   :  { %v559_v2 = vadd.f32 %v558_v53, %v512_v59 }
 0x2e0   :  { %v574_v8 = vmax.f32 %v559_v2, 0.0 }
 0x2e5   :  { %v561_v54 = vpop.f32.mrf.mxu3 }
 0x2e6   :  { %v562_v0 = vadd.f32 %v561_v54, %v517_v58 }
 0x2e8   :  { %v575_v5 = vmax.f32 %v562_v0, 0.0 }
 0x2ed   :  { %v564_v57 = vpop.f32.mrf.mxu3 }
 0x2ee   :  { %v565_v61 = vadd.f32 %v564_v57, %v522_v56 }
 0x2f0   :  { %v576_v3 = vmax.f32 %v565_v61, 0.0 }
 0x2f5   :  { %v567_v60 = vpop.f32.mrf.mxu3 }
 0x2f6   :  { %v568_v62 = vadd.f32 %v567_v60, %v527_v55 }
 0x2f8   :  { %v577_v1 = vmax.f32 %v568_v62, 0.0 }
 0x2fa   :  { %604 = vmatpush.msrb.mxu1 %v577_v1 }
 0x2fc   :  { %605 = vmatpush.msrb.mxu1 %v576_v3 }
 0x2fe   :  { %606 = vmatpush.msrb.mxu1 %v575_v5 }
 0x300   :  { %607 = vmatpush.msrb.mxu1 %v574_v8 }
 0x302   :  { %608 = vmatpush.msrb.mxu1 %v573_v12 }
 0x304   :  { %609 = vmatpush.msrb.mxu1 %v572_v15 }
 0x306   :  { %610 = vmatpush.msrb.mxu1 %v571_v16 }
 0x308   :  { %611 = vmatpush.msrb.mxu1 %v570_v17 }
 0x309   :  { %695 = vmatmul.msk.f32.vlgmr.msrb.gmra.mxu1 %vm351_vm3, %v578_v18 }
 0x311   :  { %696 = vmatmul.msk.f32.gmra.mxu1 %vm351_vm3, %v579_v19 }
 0x386   :  { %v613_v20 = vpop.f32.mrf.mxu1 }
 0x387   :  { %v614_v24 = vadd.f32 %v613_v20, %v583_v22 }
 0x389   :  { %v619_v27 = vmax.f32 %v614_v24, 0.0 }
 0x38e   :  { %v616_v23 = vpop.f32.mrf.mxu1 }
 0x38f   :  { %v617_v25 = vadd.f32 %v616_v23, %v588_v21 }
 0x391   :  { %v620_v26 = vmax.f32 %v617_v25, 0.0 }
 0x393   :  { %645 = vmatpush.msrb.mxu0 %v620_v26 }
 0x395   :  { %646 = vmatpush.msrb.mxu0 %v619_v27 }
 0x396   :  { %697 = vmatmul.msk.f32.vlgmr.msrb.gmra.mxu0 %vm181_vm2, %v621_v28 }
 0x413   :  { %v648_v31 = vpop.f32.mrf.mxu0 }
 0x414   :  { %v649_v32 = vadd.f32 %v648_v31, %v627_v30 }
 0x416   :  { %651 = vst [vmem:[#allocation3] sm:$0x1] %v649_v32 }
 0x417   :  { %662 = dma.vmem_to_hbm [thread:$0]  %s658_s3, 16, %s660_s0, [#allocation4]  }
 0x418   :  { %751 = dma.done.wait [#allocation4], 16  }
 0x419   :  { %752 = vsyncadd [#allocation4], 4294967280 }
 0x41a   :  { %667 = vsyncpa [#allocation4], 1 }

</bundles_post_ra>
